<compile_context>
chip_gen: v5e
topology: v5e:2x2
jax: 0.10.0
libtpu: 0.0.40
codegen_flags: <defaults>
</compile_context>

<pallas_src>
import math

import jax
import jax.numpy as jnp
import numpy as np
from jax import lax
from jax.experimental import pallas as pl
from jax.experimental.pallas import tpu as pltpu


def _cdiv(a: int, b: int) -> int:
    return -(-a // b)


def _roundup(a: int, m: int) -> int:
    return _cdiv(a, m) * m


# ----------------------------- weight matrices ------------------------------
def _axis_weights(in_size: int, out_size: int, mode: str) -> np.ndarray:
    """(out_size, in_size) interpolation matrix matching PyTorch semantics.

    Built on the host with exact integer (nearest) / float64 (bilinear) index
    math so boundary indices cannot drift vs PyTorch at large sizes.
    """
    if mode == "nearest":
        # PyTorch legacy 'nearest' (not 'nearest-exact'): src = floor(dst*in/out)
        dst = np.arange(out_size, dtype=np.int64)
        src = np.minimum((dst * in_size) // out_size, in_size - 1)
        w = np.zeros((out_size, in_size), np.float32)
        w[np.arange(out_size), src] = 1.0
        return w
    # bilinear, align_corners=False: src = max(scale*(dst+0.5)-0.5, 0)
    dst = np.arange(out_size, dtype=np.float64)
    scale = in_size / out_size
    src = np.maximum(scale * (dst + 0.5) - 0.5, 0.0)
    i0 = np.minimum(np.floor(src).astype(np.int64), in_size - 1)
    i1 = np.minimum(i0 + 1, in_size - 1)
    lam = src - i0
    w = np.zeros((out_size, in_size), np.float64)
    np.add.at(w, (np.arange(out_size), i0), 1.0 - lam)
    np.add.at(w, (np.arange(out_size), i1), lam)
    return w.astype(np.float32)


# --------------------------------- kernel ------------------------------------
def _make_kernel(B, Hin, Win, Hout, Wout, Houtp, h_first, g1_dtype, out_dtype):
    out_is_int = jnp.issubdtype(jnp.dtype(out_dtype), jnp.integer)

    def finalize(u):  # u is f32
        if out_is_int:
            info = jnp.iinfo(out_dtype)
            u = jnp.clip(jnp.round(u), info.min, info.max)
        return u.astype(out_dtype)

    if h_first:
        def kernel(x_ref, w1_ref, w2_ref, o_ref):
            x = x_ref[...]
            if x.dtype != g1_dtype:
                x = x.astype(g1_dtype)          # VPU cast in-kernel (int inputs)
            # H-interp: batched dot_general contracting the interior Hin axis
            # directly -> no transpose/relayout of the input block.
            w1 = jnp.broadcast_to(w1_ref[...], (B, Houtp, Hin))
            t = lax.dot_general(w1, x, (((2,), (1,)), ((0,), (0,))),
                                preferred_element_type=jnp.float32)  # (B,Houtp,Win) f32
            # W-interp: fold (B, Houtp) into the GEMM M dim; layout-free since
            # Houtp is a multiple of the f32 sublane packing.
            u = jnp.dot(t.reshape(B * Houtp, Win), w2_ref[...],
                        preferred_element_type=jnp.float32)          # (B*Houtp, Wout)
            u = u.reshape(B, Houtp, Wout)
            if Houtp != Hout:
                u = u[:, :Hout, :]
            o_ref[...] = finalize(u)
    else:
        def kernel(x_ref, w1_ref, w2_ref, o_ref):
            x = x_ref[...]
            if x.dtype != g1_dtype:
                x = x.astype(g1_dtype)
            # W-interp first: one folded matmul, M = B*Hin (layout-free merge,
            # Hin is sublane aligned for this variant by construction).
            t = jnp.dot(x.reshape(B * Hin, Win), w1_ref[...],
                        preferred_element_type=jnp.float32)          # (B*Hin, Wout)
            t = t.reshape(B, Hin, Wout)
            # H-interp: batched dot_general contracting the interior Hin axis.
            w2 = jnp.broadcast_to(w2_ref[...], (B, Hout, Hin))
            u = lax.dot_general(w2, t, (((2,), (1,)), ((0,), (0,))),
                                preferred_element_type=jnp.float32)  # (B, Hout, Wout)
            o_ref[...] = finalize(u)
    return kernel


# --------------------------------- wrapper -----------------------------------
def interpolate(x: jax.Array, width: int, height: int, mode: str) -> jax.Array:
    """Equivalent of Interpolate(width, height, mode)(x) for NCHW `x`."""
    if mode not in ("nearest", "bilinear"):
        raise NotImplementedError(f"mode={mode!r} not supported")
    N, C, Hin, Win = (int(d) for d in x.shape)
    Hout, Wout = int(height), int(width)
    NC = N * C
    out_dtype = x.dtype

    # GEMM1 runs in the input dtype when it is MXU-friendly; otherwise the
    # narrow input is DMA'd as-is and cast on the VPU inside the kernel
    # (no f32 copy of x in HBM).
    mxu_dtypes = (jnp.dtype(jnp.float32), jnp.dtype(jnp.bfloat16),
                  jnp.dtype(jnp.float16))
    g1_dtype = x.dtype if jnp.dtype(x.dtype) in mxu_dtypes else jnp.dtype(jnp.float32)
    g1_pack = max(1, 32 // jnp.dtype(g1_dtype).itemsize)   # sublane packing

    # Host-built weight matrices (exact index math).
    wh = _axis_weights(Hin, Hout, mode)      # (Hout, Hin)
    ww = _axis_weights(Win, Wout, mode)      # (Wout, Win)
    # TODO(synk): gather/lerp path for 'nearest' (mainly pays off on v5e's slow
    # MXU) and banded weights for large bilinear downsamples (K is >99% zeros)
    # would skip the dense contraction; left as follow-ups.

    # ---- contraction order (static). Neither order does an in-kernel
    # transpose any more, so the choice is pure FLOPs; W-first additionally
    # requires the input H to be sublane aligned, otherwise its M-fold would
    # force an HBM pad/copy of x (the relayout penalty from the review).
    cost_h_first = Win * Hout * (Hin + Wout)
    cost_w_first = Hin * Wout * (Win + Hout)
    w_first_ok = (Hin % g1_pack == 0)
    h_first = (not w_first_ok) or (cost_h_first <= cost_w_first)
    Houtp = _roundup(Hout, 8) if h_first else Hout   # f32 intermediate fold alignment

    # ---- per-generation VMEM / tiling parameters.
    try:
        vmem_cap = int(getattr(pltpu.get_tpu_info(), "vmem_capacity_bytes",
                               64 * 2**20))
    except Exception:
        vmem_cap = 64 * 2**20
    small_vmem = vmem_cap <= 64 * 2**20              # v7x-class (2 TCs, 64 MiB)
    budget = (20 if small_vmem else 72) * 2**20      # working-set target
    limit_cap = (40 if small_vmem else 100) * 2**20
    target_m = 512 if small_vmem else 1024           # folded-GEMM M rows to aim for

    # ---- per-image VMEM footprint: lane dim rounded to 128, sublane dims to
    # their packing, intermediates in f32, broadcast weight + cast copy included.
    lane = 128
    isz_in = jnp.dtype(x.dtype).itemsize
    isz_out = jnp.dtype(out_dtype).itemsize
    pack_in = max(1, 32 // isz_in)
    pack_out = max(1, 32 // isz_out)
    in_tile = _roundup(Hin, pack_in) * _roundup(Win, lane) * isz_in
    out_tile = _roundup(Hout, pack_out) * _roundup(Wout, lane) * isz_out
    out_val = _roundup(Hout, 8) * _roundup(Wout, lane) * 4
    if h_first:
        inter = Houtp * _roundup(Win, lane) * 4
        bcast_w = Houtp * _roundup(Hin, lane) * jnp.dtype(g1_dtype).itemsize
        m_unit = Houtp
    else:
        inter = _roundup(Hin, 8) * _roundup(Wout, lane) * 4
        bcast_w = _roundup(Hout, 8) * _roundup(Hin, lane) * 4
        m_unit = Hin
    cast_cpy = in_tile * 2 if jnp.dtype(g1_dtype) != jnp.dtype(x.dtype) else 0
    per_img = (2 * (in_tile + out_tile)              # double-buffered pipeline tiles
               + (3 * (inter + out_val)) // 2        # live values (+~1.5x for copies)
               + cast_cpy + bcast_w)
    cap_b = max(1, budget // max(1, per_img))

    # ---- pick B (images per grid step): aim for target_m GEMM rows and align
    # B*m_unit to 256 rows (full MXU tiles on v6e/v7x, also 128-aligned for v5e).
    b_tgt = max(1, _cdiv(target_m, m_unit))
    b_align = 256 // math.gcd(m_unit, 256)
    b_tgt = _roundup(b_tgt, b_align)
    B = max(1, min(NC, cap_b, b_tgt))
    steps = _cdiv(NC, B)
    if NC >= 2 and steps == 1:
        steps = 2                                    # give both TCs work
    elif steps > 1 and steps % 2 == 1:
        steps += 1                                   # even split across 2 TCs
    B = _cdiv(NC, steps)
    steps = _cdiv(NC, B)
    # TODO(synk): very large images still need H/W band tiling (a T-row output
    # band only needs ~T*scale+1 input rows) to stay inside v7x's 64 MiB VMEM.

    # ---- weights as passed to the kernel.
    if h_first:
        w1np = np.zeros((Houtp, Hin), np.float32)
        w1np[:Hout] = wh
        w1 = jnp.asarray(w1np, dtype=g1_dtype)       # GEMM1 (input dtype, zero-padded rows)
        w2 = jnp.asarray(ww.T)                       # (Win, Wout) f32, GEMM2
    else:
        w1 = jnp.asarray(ww.T, dtype=g1_dtype)       # (Win, Wout), GEMM1
        w2 = jnp.asarray(wh)                         # (Hout, Hin) f32, GEMM2

    xf = x.reshape(NC, Hin, Win)                     # free: no cast / pad in HBM

    est = B * per_img + 2 * (w1.size * w1.dtype.itemsize + w2.size * 4)
    vmem_limit = int(min(limit_cap, max(32 * 2**20, 2 * est)))
    cparams = pltpu.CompilerParams(dimension_semantics=("parallel",),
                                   vmem_limit_bytes=vmem_limit)

    kernel = _make_kernel(B, Hin, Win, Hout, Wout, Houtp, h_first,
                          g1_dtype, out_dtype)
    out = pl.pallas_call(
        kernel,
        out_shape=jax.ShapeDtypeStruct((NC, Hout, Wout), out_dtype),
        grid=(steps,),
        in_specs=[
            # TODO(synk): on 128-MiB chips with exposed input DMA, bump this to
            # pipeline_mode=pl.Buffered(3).
            pl.BlockSpec((B, Hin, Win), lambda b: (b, 0, 0)),
            pl.BlockSpec(tuple(w1.shape), lambda b: (0, 0)),
            pl.BlockSpec(tuple(w2.shape), lambda b: (0, 0)),
        ],
        out_specs=pl.BlockSpec((B, Hout, Wout), lambda b: (b, 0, 0)),
        # TODO(synk): when Wout < 128 the final vst is lane-masked; flattening
        # the output block to a lane-dense (B, Hout*Wout) slab would make it
        # unmasked, but the required in-kernel (sublane,lane)->lane merge is not
        # reliably lowerable across Mosaic versions, so it is left as a follow-up.
        compiler_params=cparams,
    )(xf, w1, w2)

    return out.reshape(N, C, Hout, Wout)


# ------------------------------ reference (JAX) ------------------------------
def _reference(x, width, height, mode):
    N, C, Hin, Win = x.shape
    wh = jnp.asarray(_axis_weights(Hin, height, mode))
    ww = jnp.asarray(_axis_weights(Win, width, mode))
    y = jnp.einsum("oh,nchw,pw->ncop", wh, x.astype(jnp.float32), ww)
    return y.astype(x.dtype)


# ---------------------------------- main -------------------------------------
if __name__ == "__main__":
    key = jax.random.PRNGKey(0)
    x = jax.random.normal(key, (2, 4, 16, 16), dtype=jnp.float32)

    # bilinear, align_corners=False, size = (height=24, width=32)
    y_b = interpolate(x, width=32, height=24, mode="bilinear")
    jax.block_until_ready(y_b)
    assert y_b.shape == (2, 4, 24, 32)
    assert jnp.allclose(y_b, _reference(x, 32, 24, "bilinear"), atol=1e-4, rtol=1e-4)

    # nearest (PyTorch legacy 'nearest', not 'nearest-exact')
    y_n = interpolate(x, width=32, height=24, mode="nearest")
    jax.block_until_ready(y_n)
    assert y_n.shape == (2, 4, 24, 32)
    assert jnp.allclose(y_n, _reference(x, 32, 24, "nearest"), atol=1e-4, rtol=1e-4)

    # the wrapper is now statically specialized (no runtime fallback / host
    # sync), so it also works under jit.
    y_j = jax.jit(lambda a: interpolate(a, 32, 24, "bilinear"))(x)
    jax.block_until_ready(y_j)
    assert jnp.allclose(y_j, y_b, atol=1e-4, rtol=1e-4)

    print("KERNEL_OK")
</pallas_src>

<mosaic_0001>
module attributes {stable_mosaic.version = 11 : i64} {
  func.func @kernel(%arg0: i32, %arg1: memref<4x16x16xf32, #tpu.memory_space<vmem>>, %arg2: memref<24x16xf32, #tpu.memory_space<vmem>>, %arg3: memref<16x32xf32, #tpu.memory_space<vmem>>, %arg4: memref<4x24x32xf32, #tpu.memory_space<vmem>>) attributes {dimension_semantics = [#tpu.dimension_semantics<parallel>], iteration_bounds = array<i64: 2>, scalar_prefetch = 0 : i64, scratch_operands = 0 : i64, tpu.core_type = #tpu.core_type<tc>, window_params = [{transform_indices = @transform_0, window_bounds = array<i64: 4, 16, 16>}, {pipeline_mode = #tpu.pipeline_mode<synchronous>, transform_indices = @transform_1, window_bounds = array<i64: 24, 16>}, {pipeline_mode = #tpu.pipeline_mode<synchronous>, transform_indices = @transform_2, window_bounds = array<i64: 16, 32>}, {transform_indices = @transform_3, window_bounds = array<i64: 4, 24, 32>}]} {
    %c0 = arith.constant 0 : index
    %c0_0 = arith.constant 0 : index
    %c0_1 = arith.constant 0 : index
    %0 = vector.load %arg1[%c0, %c0_0, %c0_1] : memref<4x16x16xf32, #tpu.memory_space<vmem>>, vector<4x16x16xf32>
    %c0_2 = arith.constant 0 : index
    %c0_3 = arith.constant 0 : index
    %1 = vector.load %arg2[%c0_2, %c0_3] : memref<24x16xf32, #tpu.memory_space<vmem>>, vector<24x16xf32>
    %2 = vector.shape_cast %1 : vector<24x16xf32> to vector<1x24x16xf32>
    %3 = vector.broadcast %2 : vector<1x24x16xf32> to vector<4x24x16xf32>
    %cst = arith.constant dense<0.000000e+00> : vector<4x24x16xf32>
    %4 = tpu.matmul %3, %0, %cst {dimension_numbers = #tpu.dot_dimension_numbers<[2], [1], [1], [2], [0, 0, 0, 1, 1, 2], [0], [0]>} : vector<4x24x16xf32>, vector<4x16x16xf32>, vector<4x24x16xf32> -> vector<4x24x16xf32>
    %5 = vector.shape_cast %4 : vector<4x24x16xf32> to vector<96x16xf32>
    %c0_4 = arith.constant 0 : index
    %c0_5 = arith.constant 0 : index
    %6 = vector.load %arg3[%c0_4, %c0_5] : memref<16x32xf32, #tpu.memory_space<vmem>>, vector<16x32xf32>
    %cst_6 = arith.constant dense<0.000000e+00> : vector<96x32xf32>
    %7 = tpu.matmul %5, %6, %cst_6 {dimension_numbers = #tpu.dot_dimension_numbers<[1], [0], [0], [1], [0, 0, 1, 1], [], []>} : vector<96x16xf32>, vector<16x32xf32>, vector<96x32xf32> -> vector<96x32xf32>
    %8 = vector.shape_cast %7 : vector<96x32xf32> to vector<4x24x32xf32>
    %c0_7 = arith.constant 0 : index
    %c0_8 = arith.constant 0 : index
    %c0_9 = arith.constant 0 : index
    %9 = vector.load %arg4[%c0_7, %c0_8, %c0_9] : memref<4x24x32xf32, #tpu.memory_space<vmem>>, vector<4x24x32xf32>
    tpu.vector_store %arg4[%c0_7, %c0_8, %c0_9], %8 {strides = array<i32>} : memref<4x24x32xf32, #tpu.memory_space<vmem>>, vector<4x24x32xf32>,
    return
  }
  func.func @transform_0(%arg0: i32) -> (i32, i32, i32) {
    %c0_i32 = arith.constant 0 : i32
    %c0_i32_0 = arith.constant 0 : i32
    %c0_i32_1 = arith.constant 0 : i32
    return %arg0, %c0_i32, %c0_i32_0 : i32, i32, i32
  }
  func.func @transform_1(%arg0: i32) -> (i32, i32) {
    %c0_i32 = arith.constant 0 : i32
    %c0_i32_0 = arith.constant 0 : i32
    %c0_i32_1 = arith.constant 0 : i32
    return %c0_i32, %c0_i32_0 : i32, i32
  }
  func.func @transform_2(%arg0: i32) -> (i32, i32) {
    %c0_i32 = arith.constant 0 : i32
    %c0_i32_0 = arith.constant 0 : i32
    %c0_i32_1 = arith.constant 0 : i32
    return %c0_i32, %c0_i32_0 : i32, i32
  }
  func.func @transform_3(%arg0: i32) -> (i32, i32, i32) {
    %c0_i32 = arith.constant 0 : i32
    %c0_i32_0 = arith.constant 0 : i32
    %c0_i32_1 = arith.constant 0 : i32
    return %arg0, %c0_i32, %c0_i32_0 : i32, i32, i32
  }
}

</mosaic_0001>

<bundles_post_ra>
// kernel: tpu_custom_call.1
= control target key start
LH: loop header
LB: loop body
LE: loop exit
PB: predicated region body
PF: predicated region fallthrough
CT: control target
= control target key end

     0   :  { %8 = vsyncpa [#allocation3], 0  ;;  %s908_s0 = inlined_call_operand.hbm [shape: f32[8,16,16], index: 0, kind: input, shape index: {}]   ;;  %s909_s1 = inlined_call_operand.vmem [shape: f32[24,16], index: 1, kind: input, shape index: {}]   ;;  %s910_s2 = inlined_call_operand.vmem [shape: f32[16,32], index: 2, kind: input, shape index: {}]   ;;  %s911_s3 = inlined_call_operand.hbm [shape: f32[8,24,32], index: 3, kind: output, shape index: {}]  }
   0x1   :  { %10 = vsyncpa [#allocation3 + $0x1], 0 }
   0x2   :  { %11 = vsyncpa [#allocation4], 0 }
   0x3   :  { %13 = vsyncpa [#allocation4 + $0x1], 0  ;;  %s729_s12 = smov 0   ;;  %s731_s13 = smov 0  }
   0x4   :  { %s733_s14 = smov 0   ;;  %s735_s15 = smov 0  }
   0x5 LB: > { %s750_s16 = sadd.s32 4294967295, %s703_s15   ;;  %s513_s17 = sadd.s32 4294967294, %s703_s15   ;;  %s703_s15 = sphi %s735_s15, %s921_s15   ;;  %s699_s14 = sphi %s733_s14, %s920_s14   ;;  %s695_s13 = sphi %s731_s13, %s919_s13   ;;  %s691_s12 = sphi %s729_s12, %s918_s12  }
   0x6   : > { %s754_s18 = sadd.s32 1, %s703_s15   ;;  %s26_s19 = sadd.s32 1, %s699_s14 }
   0x7   : > { %s23_s20 = ssub.s32 %s703_s15, %s754_s18  ;;  %p33_p0 = scmp.ne.s32.totalorder %s699_s14, %s695_s13 }
   0x8   : > { %p24_p1 = scmp.eq.s32.totalorder %s23_s20, 0  ;;  %p34_p2 = scmp.eq.s32.totalorder %s703_s15, 0 }
   0x9   : > { %p39_p3 = scmp.ne.s32.totalorder %s695_s13, %s691_s12  ;;  %p40_p4 = scmp.eq.s32.totalorder %s750_s16, 0 }
   0xa   : > { %s766_s21 = scalar_select %p24_p1, %s699_s14, %s26_s19  }
   0xb   : > { %p768_p5 = por %p34_p2, %p33_p0  ;;  %p772_p6 = por %p40_p4, %p39_p3 }
   0xc   : > { %p105_p7 = scmp.eq.s32.totalorder %s750_s16, 1  ;;  %p111_p8 = scmp.eq.s32.totalorder %s513_s17, 1 }
   0xd   : > { %p569_p10 = scmp.lt.s32.totalorder %s703_s15, 2  ;;  %s137_s26 = sand.u32 1, %s699_s14  }
   0xe   : > { %p779_p11 = por %p105_p7, %p33_p0  ;;  %p783_p12 = por %p111_p8, %p39_p3 }
   0xf   : > { %s552_s27 = sshll.u32 %s703_s15, 6  ;;  %s516_s28 = sshll.u32 %s137_s26, 6 }
  0x10   : > { %s147_s4 = scalar_lea.hbm %s908_s0, %s552_s27  ;;  %s141_s6 = scalar_lea.vmem [#allocation2], %s516_s28 }
  0x11   : > { %s148_s5 = sshll.u32 %s147_s4, 4  ;;  %s150_s7 = sshll.u32 %s141_s6, 4  ;;  %s149_s5 = int_to_ptr.hbm [resolvable:$true] %s148_s5  ;;  %s151_s7 = int_to_ptr.vmem [resolvable:$true] %s150_s7 }
  0x12   : > { %p794_p13 = pnand %p569_p10, %p768_p5  ;;  %p520_p0 = scmp.ge.s32.totalorder %s703_s15, 1 }
  0x13   : > { %p158_p1 = scmp.lt.s32.totalorder %s703_s15, 3  ;;  %s138_s9 = scalar_lea.sflag [#allocation3], %s137_s26 }
  0x14   : > { %s607_s10 = sshra.s32 %s149_s5, 4  ;;  %p611_p3 = pneg %p794_p13  ;;  %s608_s10 = int_to_ptr.hbm [resolvable:$true] %s607_s10 }
  0x15   : > { %s609_s11 = scalar_lea.hbm %s608_s10, 64  ;;  %s614_s20 = scalar_lea.hbm %s908_s0, 128 }
  0x16   : > { %p610_p2 = scmp.ne.s32.totalorder %s608_s10, %s609_s11  ;;  %p615_p5 = scmp.lt.s32.totalorder %s608_s10, %s908_s0 }
  0x17   : > { %p616_p8 = scmp.lt.s32.totalorder %s614_s20, %s609_s11 }
  0x18   : > { %p612_p4 = pnand %p611_p3, %p610_p2 }
  0x19   : > { %p617_p10 = por %p616_p8, %p615_p5 }
  0x1a   : > { %p613_p7 = pneg %p612_p4 }
  0x1c   : > { %p618_p9 = pnand %p617_p10, %p613_p7 }
  0x1e   : > { %621 = shalt.err (!%p618_p9)
}
  0x1f   : > { %s705_s26 = smov 128   ;;  %s706_s28 = smov 8  }
  0x20   : > { %564 = dma.hbm_to_vmem [thread:$0]  (!%p794_p13), %s149_s5, 1024, %s151_s7, %s138_s9, %s705_s26, %s705_s26, %s706_s28  }
  0x21   : > { %p159_p2 = pnand %p520_p0, %p158_p1 }
  0x22   : > { %s815_s29 = sand.u32 (!%p159_p2), 1, %s695_s13  }
  0x23   : > { %162 = sbr.rel (%p159_p2) target bundleno = 353 (0x161), region = 32  ;;  %s521_s30 = sshll.u32 (!%p159_p2), %s815_s29, 6 }
  0x24   : > { %s165_s4 = scalar_lea.sflag (!%p159_p2), [#allocation3], %s815_s29  ;;  %s168_s6 = scalar_lea.vmem (!%p159_p2), [#allocation2], %s521_s30 }
  0x28   : > { %682 = dma.done.wait (%p772_p6), %s165_s4, 1024  }
  0x29   : > { %684 = vsyncadd (%p772_p6), %s165_s4, 4294966272  ;;  %v199_v0 = vld [vmem:[%s168_s6 + $0x28] sm:$0xff]  ;;  %v198_v1 = vld [vmem:[%s168_s6 + $0x20] sm:$0xff]  ;;  %vm205_vm0 = vcmask 130048   ;;  %s555_s22 = smul.u32 96, %s815_s29  ;;  %vm410_vm1 = vcmask 261120  }
  0x2a   : > { %281 = vmatpush.msra.mxu3 %v199_v0  ;;  %v202_v2 = vld [vmem:[%s909_s1] sm:$0xff]  ;;  %v195_v3 = vld [vmem:[%s168_s6 + $0x8] sm:$0xff]  ;;  %v201_v4 = vld [vmem:[%s168_s6 + $0x38] sm:$0xff]  ;;  %s556_s26 = smul.u32 96, %s750_s16  ;;  %s424_s7 = scalar_lea.sflag [#allocation4], %s815_s29 }
  0x2b   : > { %229 = vmatpush.msra.mxu1 %v195_v3  ;;  %v194_v5 = vld [vmem:[%s168_s6] sm:$0xff]  ;;  %v197_v6 = vld [vmem:[%s168_s6 + $0x18] sm:$0xff]  ;;  %v200_v7 = vld [vmem:[%s168_s6 + $0x30] sm:$0xff]  ;;  %s191_s27 = scalar_lea.vmem [#allocation5], %s555_s22  ;;  %s657_s10 = scalar_lea.hbm %s911_s3, 192 }
  0x2c   : > { %282 = vmatpush.msra.mxu3 %v198_v1  ;;  %v196_v8 = vld [vmem:[%s168_s6 + $0x10] sm:$0xff]  ;;  %v203_v9 = vld [vmem:[%s909_s1 + $0x8] sm:$0xff]  ;;  %v319_v12 = vld [vmem:[%s910_s2] sm:$0xff]  ;;  %s436_s4 = scalar_lea.hbm %s911_s3, %s556_s26  ;;  %s437_s6 = sshll.u32 %s191_s27, 4  ;;  %s438_s6 = int_to_ptr.vmem [resolvable:$true] %s437_s6 }
  0x2d   : > { %528 = vmatmul.msk.f32.vlgmr.msra.gmra.mxu3 %vm205_vm0, %v202_v2  ;;  %230 = vmatpush.msra.mxu1 %v194_v5  ;;  %v320_v10 = vld [vmem:[%s910_s2 + $0x8] sm:$0xff]  ;;  %v204_v11 = vld [vmem:[%s909_s1 + $0x10] sm:$0xff]  ;;  %s439_s5 = sshll.u32 %s436_s4, 4  ;;  %s440_s5 = int_to_ptr.hbm [resolvable:$true] %s439_s5 }
  0x2e   : > { %307 = vmatpush.msrb.mxu3 %v201_v4  ;;  %522 = vmatmul.msk.f32.vlgmr.msra.gmra.mxu1 %vm205_vm0, %v202_v2  ;;  %s651_s16 = sshra.s32 %s440_s5, 4  ;;  %s652_s16 = int_to_ptr.hbm [resolvable:$true] %s651_s16 }
  0x2f   : > { %255 = vmatpush.msrb.mxu1 %v197_v6  ;;  %553 = vmatpush.msra.mxu2 %v320_v10  ;;  %s653_s23 = scalar_lea.hbm %s652_s16, 96  ;;  %p658_p0 = scmp.lt.s32.totalorder %s652_s16, %s911_s3 }
  0x30   : > { %308 = vmatpush.msrb.mxu3 %v200_v7  ;;  %371 = vmatpush.msra.mxu0 %v320_v10  ;;  %p654_p6 = scmp.ne.s32.totalorder %s652_s16, %s653_s23  ;;  %p659_p1 = scmp.lt.s32.totalorder %s657_s10, %s653_s23 }
  0x31   : > { %256 = vmatpush.msrb.mxu1 %v196_v8  ;;  %554 = vmatpush.msra.mxu2 %v319_v12 }
  0x32   : > { %372 = vmatpush.msra.mxu0 %v319_v12  ;;  %p655_p9 = pnand %p654_p6, %p779_p11  ;;  %p660_p3 = por %p659_p1, %p658_p0 }
  0x34   : > { %p656_p13 = pneg %p655_p9 }
  0x35   : > { %529 = vmatmul.msk.f32.gmra.mxu3 %vm205_vm0, %v203_v9 }
  0x36   : > { %523 = vmatmul.msk.f32.gmra.mxu1 %vm205_vm0, %v203_v9  ;;  %p661_p4 = pnand %p660_p3, %p656_p13 }
  0x3d   : > { %530 = vmatmul.msk.f32.gmra.mxu3 %vm205_vm0, %v204_v11 }
  0x3e   : > { %524 = vmatmul.msk.f32.gmra.mxu1 %vm205_vm0, %v204_v11 }
  0x45   : > { %531 = vmatmul.msk.f32.vlgmr.msrb.gmra.mxu3 %vm205_vm0, %v202_v2 }
  0x46   : > { %525 = vmatmul.msk.f32.vlgmr.msrb.gmra.mxu1 %vm205_vm0, %v202_v2 }
  0x4d   : > { %532 = vmatmul.msk.f32.gmra.mxu3 %vm205_vm0, %v203_v9 }
  0x4e   : > { %526 = vmatmul.msk.f32.gmra.mxu1 %vm205_vm0, %v203_v9 }
  0x55   : > { %533 = vmatmul.msk.f32.gmra.mxu3 %vm205_vm0, %v204_v11 }
  0x56   : > { %527 = vmatmul.msk.f32.gmra.mxu1 %vm205_vm0, %v204_v11 }
  0xab   : > { %v232_v13 = vpop.f32.mrf.mxu1 }
  0xac   : > { %534 = vmatmul.msk.f32.vlgmr.msra.gmra.mxu0 %vm205_vm0, %v232_v13 }
  0xb0   : > { %v284_v14 = vpop.f32.mrf.mxu3 }
  0xb1   : > { %540 = vmatmul.msk.f32.vlgmr.msra.gmra.mxu2 %vm205_vm0, %v284_v14 }
  0xb3   : > { %v235_v15 = vpop.f32.mrf.mxu1 }
  0xb4   : > { %535 = vmatmul.msk.f32.gmra.mxu0 %vm205_vm0, %v235_v15 }
  0xb8   : > { %v287_v16 = vpop.f32.mrf.mxu3 }
  0xb9   : > { %541 = vmatmul.msk.f32.gmra.mxu2 %vm205_vm0, %v287_v16 }
  0xbb   : > { %v238_v17 = vpop.f32.mrf.mxu1 }
  0xbc   : > { %536 = vmatmul.msk.f32.gmra.mxu0 %vm205_vm0, %v238_v17 }
  0xc0   : > { %v290_v18 = vpop.f32.mrf.mxu3 }
  0xc1   : > { %542 = vmatmul.msk.f32.gmra.mxu2 %vm205_vm0, %v290_v18 }
  0xc3   : > { %v258_v19 = vpop.f32.mrf.mxu1 }
  0xc4   : > { %537 = vmatmul.msk.f32.gmra.mxu0 %vm205_vm0, %v258_v19 }
  0xc8   : > { %v310_v20 = vpop.f32.mrf.mxu3 }
  0xc9   : > { %543 = vmatmul.msk.f32.gmra.mxu2 %vm205_vm0, %v310_v20 }
  0xcb   : > { %v261_v21 = vpop.f32.mrf.mxu1 }
  0xcc   : > { %538 = vmatmul.msk.f32.gmra.mxu0 %vm205_vm0, %v261_v21 }
  0xd0   : > { %v313_v22 = vpop.f32.mrf.mxu3 }
  0xd1   : > { %544 = vmatmul.msk.f32.gmra.mxu2 %vm205_vm0, %v313_v22 }
  0xd3   : > { %v264_v23 = vpop.f32.mrf.mxu1 }
  0xd4   : > { %539 = vmatmul.msk.f32.gmra.mxu0 %vm205_vm0, %v264_v23 }
  0xd8   : > { %v316_v24 = vpop.f32.mrf.mxu3 }
  0xd9   : > { %545 = vmatmul.msk.f32.gmra.mxu2 %vm205_vm0, %v316_v24 }
 0x129   : > { %v374_v25 = vpop.f32.mrf.mxu0 }
 0x12a   : > { %411 = vst.msk [vmem:[%s191_s27] sm:$0xff] %vm410_vm1, %v374_v25 }
 0x131   : > { %v377_v26 = vpop.f32.mrf.mxu0 }
 0x132   : > { %412 = vst.msk [vmem:[%s191_s27 + $0x8] sm:$0xff] %vm410_vm1, %v377_v26 }
 0x134   : > { %v392_v27 = vpop.f32.mrf.mxu2 }
 0x135   : > { %417 = vst.msk [vmem:[%s191_s27 + $0x30] sm:$0xff] %vm410_vm1, %v392_v27 }
 0x139   : > { %v380_v28 = vpop.f32.mrf.mxu0 }
 0x13a   : > { %413 = vst.msk [vmem:[%s191_s27 + $0x10] sm:$0xff] %vm410_vm1, %v380_v28 }
 0x13c   : > { %v395_v29 = vpop.f32.mrf.mxu2 }
 0x13d   : > { %418 = vst.msk [vmem:[%s191_s27 + $0x38] sm:$0xff] %vm410_vm1, %v395_v29 }
 0x141   : > { %v383_v30 = vpop.f32.mrf.mxu0 }
 0x142   : > { %414 = vst.msk [vmem:[%s191_s27 + $0x18] sm:$0xff] %vm410_vm1, %v383_v30 }
 0x144   : > { %v398_v31 = vpop.f32.mrf.mxu2 }
 0x145   : > { %419 = vst.msk [vmem:[%s191_s27 + $0x40] sm:$0xff] %vm410_vm1, %v398_v31 }
 0x149   : > { %v386_v32 = vpop.f32.mrf.mxu0 }
 0x14a   : > { %415 = vst.msk [vmem:[%s191_s27 + $0x20] sm:$0xff] %vm410_vm1, %v386_v32 }
 0x14c   : > { %v401_v33 = vpop.f32.mrf.mxu2 }
 0x14d   : > { %420 = vst.msk [vmem:[%s191_s27 + $0x48] sm:$0xff] %vm410_vm1, %v401_v33 }
 0x151   : > { %v389_v34 = vpop.f32.mrf.mxu0 }
 0x152   : > { %416 = vst.msk [vmem:[%s191_s27 + $0x28] sm:$0xff] %vm410_vm1, %v389_v34 }
 0x154   : > { %v404_v35 = vpop.f32.mrf.mxu2 }
 0x155   : > { %421 = vst.msk [vmem:[%s191_s27 + $0x50] sm:$0xff] %vm410_vm1, %v404_v35 }
 0x15c   : > { %v407_v36 = vpop.f32.mrf.mxu2 }
 0x15d   : > { %422 = vst.msk [vmem:[%s191_s27 + $0x58] sm:$0xff] %vm410_vm1, %v407_v36 }
 0x15e   : > { %664 = shalt.err (!%p661_p4)
}
 0x15f   : > { %s707_s29 = smov 128   ;;  %s708_s19 = smov 8  }
 0x160   : > { %559 = dma.vmem_to_hbm [thread:$0]  (%p779_p11), %s438_s6, 1536, %s440_s5, %s424_s7, %s707_s29, %s707_s29, %s708_s19  }
 0x161 PF: > { %s454_s20 = sand.u32 1, %s691_s12   ;;  %p917_p7 = scmp.ge.s32.totalorder %s703_s15, 2 }
 0x162   : > { %s455_s22 = scalar_lea.sflag [#allocation4], %s454_s20 }
 0x163   : > { %p566_p5 = pnand %p917_p7, %p783_p12 }
 0x165   : > { %p567_p8 = pneg %p566_p5 }
 0x167   : > { %686 = dma.done.wait (%p567_p8), %s455_s22, 1536  }
 0x168   : > { %688 = vsyncadd (%p567_p8), %s455_s22, 4294965760  ;;  %p16_p10 = scmp.ge.s32.totalorder %s754_s18, 4   ;;  %s918_s12 = smov %s695_s13 }
 0x169   : > { %s919_s13 = smov %s699_s14  ;;  %s920_s14 = smov %s766_s21 }
 0x16a   : > { %s921_s15 = smov %s754_s18  ;;  %18 = sbr.rel (!%p16_p10) target bundleno = 5 (0x5), region = 77 }
 0x16f   :  { %461 = vsyncpa [#allocation3], 1 }
 0x170   :  { %463 = vsyncpa [#allocation3 + $0x1], 1 }
 0x171   :  { %464 = vsyncpa [#allocation4], 1 }
 0x172   :  { %466 = vsyncpa [#allocation4 + $0x1], 1 }

</bundles_post_ra>
